<compile_context>
chip_gen: v7x
topology: tpu7x:2x2x1
jax: 0.10.0
libtpu: 0.0.40
codegen_flags: <defaults>
</compile_context>

<pallas_src>
import functools

import jax
import jax.numpy as jnp
from jax.experimental import pallas as pl
from jax.experimental.pallas import tpu as pltpu

EMOTION_CLASSES = ['neutral', 'calm', 'happy', 'sad', 'angry', 'fear',
                   'disgust', 'surprise']
NUM_CLASSES = len(EMOTION_CLASSES)

_LANE = 128
_SUBLANE = 8
_SAMPLE_QUANTUM = _LANE * _SUBLANE      # 1024 samples = one (8,128) f32 slab


def build_class_weights(class_weights: dict) -> jnp.ndarray:
    """Mirror of WeightedFocalLoss.__init__: dict -> dense (C,) weight vector."""
    w = [0.0] * NUM_CLASSES
    for emotion, weight in class_weights.items():
        w[EMOTION_CLASSES.index(emotion)] = float(weight)
    return jnp.asarray(w, dtype=jnp.float32)


def _pow_static(x, gamma):
    """x**gamma with integer-gamma specialization (VPU muls, no EUP pow)."""
    g = float(gamma)
    if g == int(g) and int(g) >= 0:
        n = int(g)
        if n == 0:
            return jnp.ones_like(x)
        out = x
        for _ in range(n - 1):
            out = out * x
        return out
    # non-integer gamma: x is already clamped >= 0 by the caller
    return jnp.power(x, jnp.float32(g))


def _focal_loss_kernel(logits_ref, targets_ref, weights_ref, out_ref, *, gamma):
    """One batch tile.

    logits_ref : [C, bt, 128]  input dtype (f32/bf16), class-major, lane-dense
    targets_ref: [bt, 128]     int32; padded lanes hold the sentinel C
    weights_ref: [C]           f32 SMEM scalars (per-class CE weights)
    out_ref    : [8, 128]      f32 lane-dense partial sums for this tile
    """
    C, bt, _ = logits_ref.shape
    tgt = targets_ref[...]                                   # [bt, 128] int32

    # ---- pass 1: running max over classes + select target logit / weight ----
    # Sentinel-padded lanes (tgt == C) never match -> w_t stays 0 -> focal = 0.
    x0 = logits_ref[0].astype(jnp.float32)                   # [bt, 128]
    m = x0
    logit_t = jnp.where(tgt == 0, x0, 0.0)
    w_t = jnp.where(tgt == 0, weights_ref[0], 0.0)
    for c in range(1, C):                                    # static unroll, C == 8
        xc = logits_ref[c].astype(jnp.float32)
        m = jnp.maximum(m, xc)
        logit_t = jnp.where(tgt == c, xc, logit_t)
        w_t = jnp.where(tgt == c, weights_ref[c], w_t)

    # ---- pass 2: stable log-sum-exp, streamed per class ([bt,128] strips) ----
    se = jnp.zeros_like(m)
    for c in range(C):
        se = se + jnp.exp(logits_ref[c].astype(jnp.float32) - m)
    lse = m + jnp.log(se)                                    # [bt, 128]

    # weighted cross_entropy(reduction='none') (torch semantics), focal term
    ce = w_t * (lse - logit_t)                               # = -w_t * logp_t
    pt = jnp.exp(-ce)
    one_minus_pt = jnp.maximum(1.0 - pt, 0.0)                # clamp exp rounding
    focal = _pow_static(one_minus_pt, gamma) * ce            # [bt, 128]
    # NOTE: alpha and the 1/B mean are folded into one scale outside.

    # fold the tile to a lane-dense (8, 128) partial block (pure VPU adds)
    out_ref[...] = jnp.sum(focal.reshape(bt // 8, 8, 128), axis=0)


def _choose_blocks(batch, max_block_b=64 * 1024):
    """Pick (block_b, nblocks, padded_b); block_b is a multiple of 1024."""
    padded_min = -(-batch // _SAMPLE_QUANTUM) * _SAMPLE_QUANTUM
    if padded_min >= 2 * _SAMPLE_QUANTUM:
        # >= 2 blocks so the "parallel" axis can shard across v7x's 2 TCs;
        # on single-TC v5e/v6e this only adds one ~0.35us grid step.
        nblocks = max(2, -(-padded_min // max_block_b))
    else:
        nblocks = 1
    per_block = -(-padded_min // nblocks)
    block_b = -(-per_block // _SAMPLE_QUANTUM) * _SAMPLE_QUANTUM
    padded_b = nblocks * block_b          # padding waste bounded by ~nblocks*1024
    return block_b, nblocks, padded_b


def weighted_focal_loss_class_major(logits_cm, targets, class_weights,
                                    alpha=0.25, gamma=2.0):
    """Focal loss with class-major logits.

    logits_cm: [C, B] (f32 or bf16), targets: [B] int, class_weights: [C].
    Preferred entry point: the reshape to the lane-dense kernel layout is a
    free view (no transpose / extra HBM pass).
    """
    C, B = logits_cm.shape
    block_b, nblocks, padded_b = _choose_blocks(B)
    bt = block_b // _LANE

    targets_i = targets.astype(jnp.int32)
    if padded_b != B:
        pad = padded_b - B
        logits_cm = jnp.pad(logits_cm, ((0, 0), (0, pad)))
        # sentinel = C: padded lanes never match a class -> zero contribution
        targets_i = jnp.pad(targets_i, (0, pad), constant_values=C)

    # free views: contiguous reshapes, no data movement
    logits_lb = logits_cm.reshape(C, padded_b // _LANE, _LANE)
    targets_lb = targets_i.reshape(padded_b // _LANE, _LANE)
    weights_f32 = class_weights.astype(jnp.float32).reshape(C)

    kernel = functools.partial(_focal_loss_kernel, gamma=float(gamma))

    partials = pl.pallas_call(
        kernel,
        out_shape=jax.ShapeDtypeStruct((nblocks * 8, _LANE), jnp.float32),
        grid=(nblocks,),
        in_specs=[
            # logits tile; default double-buffering is enough (compute per
            # tile comfortably covers the ~block_b*C*bytes DMA).
            pl.BlockSpec((C, bt, _LANE), lambda i: (0, i, 0)),
            pl.BlockSpec((bt, _LANE), lambda i: (i, 0)),           # targets
            pl.BlockSpec(memory_space=pltpu.MemorySpace.SMEM),     # weights
        ],
        out_specs=pl.BlockSpec((8, _LANE), lambda i: (i, 0)),      # partials
        compiler_params=pltpu.CompilerParams(
            dimension_semantics=("parallel",)),
    )(logits_lb, targets_lb, weights_f32)

    # alpha and the batch mean applied once, outside the kernel
    return jnp.float32(float(alpha) / B) * jnp.sum(partials)


def weighted_focal_loss(logits, targets, class_weights, alpha=0.25, gamma=2.0):
    """Torch-compatible signature: logits [B, C], targets [B]."""
    # TODO(synk): emit class-major [C, B] logits directly from the upstream
    # classifier matmul to drop this transpose (one extra HBM pass at large B).
    return weighted_focal_loss_class_major(logits.T, targets, class_weights,
                                            alpha=alpha, gamma=gamma)


def _reference(logits, targets, class_weights, alpha=0.25, gamma=2.0):
    # pure-JAX reference of torch cross_entropy(weight=..., reduction='none')
    logp = jax.nn.log_softmax(logits.astype(jnp.float32), axis=-1)
    logp_t = jnp.take_along_axis(logp, targets[:, None], axis=-1)[:, 0]
    w_t = class_weights[targets]
    ce = -w_t * logp_t
    pt = jnp.exp(-ce)
    return jnp.mean(alpha * (1.0 - pt) ** gamma * ce)


if __name__ == "__main__":
    key = jax.random.PRNGKey(0)
    C = NUM_CLASSES

    # deterministic class-weight dict, as the module's __init__ would receive
    cw_dict = {name: 1.0 + 0.1 * i for i, name in enumerate(EMOTION_CLASSES)}
    class_weights = build_class_weights(cw_dict)

    cases = [
        (8, jnp.float32),       # tiny batch, single block
        (1500, jnp.float32),    # 2 grid blocks + sentinel padding
        (1500, jnp.bfloat16),   # bf16 logits at the HBM boundary
    ]
    for B, dtype in cases:
        k_logits, k_targets = jax.random.split(jax.random.fold_in(key, B))
        logits = jax.random.normal(k_logits, (B, C), dtype=jnp.float32)
        logits = logits.astype(dtype)
        targets = jax.random.randint(k_targets, (B,), 0, C, dtype=jnp.int32)

        loss = weighted_focal_loss(logits, targets, class_weights,
                                   alpha=0.25, gamma=2.0)
        loss = jax.block_until_ready(loss)

        ref = _reference(logits, targets, class_weights, alpha=0.25, gamma=2.0)
        assert jnp.allclose(loss, ref, rtol=1e-4, atol=1e-6), (B, dtype, loss, ref)

    print("KERNEL_OK")
</pallas_src>

<mosaic_0001>
module attributes {stable_mosaic.version = 11 : i64} {
  func.func @_focal_loss_kernel(%arg0: i32, %arg1: memref<8x8x128xf32, #tpu.memory_space<vmem>>, %arg2: memref<8x128xi32, #tpu.memory_space<vmem>>, %arg3: memref<8xf32, #tpu.memory_space<smem>>, %arg4: memref<8x128xf32, #tpu.memory_space<vmem>>) attributes {dimension_semantics = [#tpu.dimension_semantics<parallel>], iteration_bounds = array<i64: 1>, scalar_prefetch = 0 : i64, scratch_operands = 0 : i64, tpu.core_type = #tpu.core_type<tc>, window_params = [{transform_indices = @transform_0, window_bounds = array<i64: 8, 8, 128>}, {transform_indices = @transform_1, window_bounds = array<i64: 8, 128>}, {transform_indices = @transform_2, window_bounds = array<i64: 8>}, {transform_indices = @transform_3, window_bounds = array<i64: 8, 128>}]} {
    %c0 = arith.constant 0 : index
    %c0_0 = arith.constant 0 : index
    %0 = vector.load %arg2[%c0, %c0_0] : memref<8x128xi32, #tpu.memory_space<vmem>>, vector<8x128xi32>
    %c0_1 = arith.constant 0 : index
    %c0_2 = arith.constant 0 : index
    %c0_3 = arith.constant 0 : index
    %1 = vector.load %arg1[%c0_1, %c0_2, %c0_3] : memref<8x8x128xf32, #tpu.memory_space<vmem>>, vector<1x8x128xf32>
    %2 = vector.shape_cast %1 : vector<1x8x128xf32> to vector<8x128xf32>
    %c0_i32 = arith.constant 0 : i32
    %3 = vector.broadcast %c0_i32 : i32 to vector<8x128xi32>
    %4 = arith.cmpi eq, %0, %3 : vector<8x128xi32>
    %cst = arith.constant 0.000000e+00 : f32
    %5 = vector.broadcast %cst : f32 to vector<8x128xf32>
    %6 = arith.select %4, %2, %5 : vector<8x128xi1>, vector<8x128xf32>
    %c0_i32_4 = arith.constant 0 : i32
    %7 = vector.broadcast %c0_i32_4 : i32 to vector<8x128xi32>
    %8 = arith.cmpi eq, %0, %7 : vector<8x128xi32>
    %c0_5 = arith.constant 0 : index
    %9 = memref.load %arg3[%c0_5] : memref<8xf32, #tpu.memory_space<smem>>
    %cst_6 = arith.constant 0.000000e+00 : f32
    %10 = vector.broadcast %9 : f32 to vector<8x128xf32>
    %11 = vector.broadcast %cst_6 : f32 to vector<8x128xf32>
    %12 = arith.select %8, %10, %11 : vector<8x128xi1>, vector<8x128xf32>
    %c1 = arith.constant 1 : index
    %c0_7 = arith.constant 0 : index
    %c0_8 = arith.constant 0 : index
    %13 = vector.load %arg1[%c1, %c0_7, %c0_8] : memref<8x8x128xf32, #tpu.memory_space<vmem>>, vector<1x8x128xf32>
    %14 = vector.shape_cast %13 : vector<1x8x128xf32> to vector<8x128xf32>
    %15 = arith.maximumf %2, %14 : vector<8x128xf32>
    %c1_i32 = arith.constant 1 : i32
    %16 = vector.broadcast %c1_i32 : i32 to vector<8x128xi32>
    %17 = arith.cmpi eq, %0, %16 : vector<8x128xi32>
    %18 = arith.select %17, %14, %6 : vector<8x128xi1>, vector<8x128xf32>
    %c1_i32_9 = arith.constant 1 : i32
    %19 = vector.broadcast %c1_i32_9 : i32 to vector<8x128xi32>
    %20 = arith.cmpi eq, %0, %19 : vector<8x128xi32>
    %c1_10 = arith.constant 1 : index
    %21 = memref.load %arg3[%c1_10] : memref<8xf32, #tpu.memory_space<smem>>
    %22 = vector.broadcast %21 : f32 to vector<8x128xf32>
    %23 = arith.select %20, %22, %12 : vector<8x128xi1>, vector<8x128xf32>
    %c2 = arith.constant 2 : index
    %c0_11 = arith.constant 0 : index
    %c0_12 = arith.constant 0 : index
    %24 = vector.load %arg1[%c2, %c0_11, %c0_12] : memref<8x8x128xf32, #tpu.memory_space<vmem>>, vector<1x8x128xf32>
    %25 = vector.shape_cast %24 : vector<1x8x128xf32> to vector<8x128xf32>
    %26 = arith.maximumf %15, %25 : vector<8x128xf32>
    %c2_i32 = arith.constant 2 : i32
    %27 = vector.broadcast %c2_i32 : i32 to vector<8x128xi32>
    %28 = arith.cmpi eq, %0, %27 : vector<8x128xi32>
    %29 = arith.select %28, %25, %18 : vector<8x128xi1>, vector<8x128xf32>
    %c2_i32_13 = arith.constant 2 : i32
    %30 = vector.broadcast %c2_i32_13 : i32 to vector<8x128xi32>
    %31 = arith.cmpi eq, %0, %30 : vector<8x128xi32>
    %c2_14 = arith.constant 2 : index
    %32 = memref.load %arg3[%c2_14] : memref<8xf32, #tpu.memory_space<smem>>
    %33 = vector.broadcast %32 : f32 to vector<8x128xf32>
    %34 = arith.select %31, %33, %23 : vector<8x128xi1>, vector<8x128xf32>
    %c3 = arith.constant 3 : index
    %c0_15 = arith.constant 0 : index
    %c0_16 = arith.constant 0 : index
    %35 = vector.load %arg1[%c3, %c0_15, %c0_16] : memref<8x8x128xf32, #tpu.memory_space<vmem>>, vector<1x8x128xf32>
    %36 = vector.shape_cast %35 : vector<1x8x128xf32> to vector<8x128xf32>
    %37 = arith.maximumf %26, %36 : vector<8x128xf32>
    %c3_i32 = arith.constant 3 : i32
    %38 = vector.broadcast %c3_i32 : i32 to vector<8x128xi32>
    %39 = arith.cmpi eq, %0, %38 : vector<8x128xi32>
    %40 = arith.select %39, %36, %29 : vector<8x128xi1>, vector<8x128xf32>
    %c3_i32_17 = arith.constant 3 : i32
    %41 = vector.broadcast %c3_i32_17 : i32 to vector<8x128xi32>
    %42 = arith.cmpi eq, %0, %41 : vector<8x128xi32>
    %c3_18 = arith.constant 3 : index
    %43 = memref.load %arg3[%c3_18] : memref<8xf32, #tpu.memory_space<smem>>
    %44 = vector.broadcast %43 : f32 to vector<8x128xf32>
    %45 = arith.select %42, %44, %34 : vector<8x128xi1>, vector<8x128xf32>
    %c4 = arith.constant 4 : index
    %c0_19 = arith.constant 0 : index
    %c0_20 = arith.constant 0 : index
    %46 = vector.load %arg1[%c4, %c0_19, %c0_20] : memref<8x8x128xf32, #tpu.memory_space<vmem>>, vector<1x8x128xf32>
    %47 = vector.shape_cast %46 : vector<1x8x128xf32> to vector<8x128xf32>
    %48 = arith.maximumf %37, %47 : vector<8x128xf32>
    %c4_i32 = arith.constant 4 : i32
    %49 = vector.broadcast %c4_i32 : i32 to vector<8x128xi32>
    %50 = arith.cmpi eq, %0, %49 : vector<8x128xi32>
    %51 = arith.select %50, %47, %40 : vector<8x128xi1>, vector<8x128xf32>
    %c4_i32_21 = arith.constant 4 : i32
    %52 = vector.broadcast %c4_i32_21 : i32 to vector<8x128xi32>
    %53 = arith.cmpi eq, %0, %52 : vector<8x128xi32>
    %c4_22 = arith.constant 4 : index
    %54 = memref.load %arg3[%c4_22] : memref<8xf32, #tpu.memory_space<smem>>
    %55 = vector.broadcast %54 : f32 to vector<8x128xf32>
    %56 = arith.select %53, %55, %45 : vector<8x128xi1>, vector<8x128xf32>
    %c5 = arith.constant 5 : index
    %c0_23 = arith.constant 0 : index
    %c0_24 = arith.constant 0 : index
    %57 = vector.load %arg1[%c5, %c0_23, %c0_24] : memref<8x8x128xf32, #tpu.memory_space<vmem>>, vector<1x8x128xf32>
    %58 = vector.shape_cast %57 : vector<1x8x128xf32> to vector<8x128xf32>
    %59 = arith.maximumf %48, %58 : vector<8x128xf32>
    %c5_i32 = arith.constant 5 : i32
    %60 = vector.broadcast %c5_i32 : i32 to vector<8x128xi32>
    %61 = arith.cmpi eq, %0, %60 : vector<8x128xi32>
    %62 = arith.select %61, %58, %51 : vector<8x128xi1>, vector<8x128xf32>
    %c5_i32_25 = arith.constant 5 : i32
    %63 = vector.broadcast %c5_i32_25 : i32 to vector<8x128xi32>
    %64 = arith.cmpi eq, %0, %63 : vector<8x128xi32>
    %c5_26 = arith.constant 5 : index
    %65 = memref.load %arg3[%c5_26] : memref<8xf32, #tpu.memory_space<smem>>
    %66 = vector.broadcast %65 : f32 to vector<8x128xf32>
    %67 = arith.select %64, %66, %56 : vector<8x128xi1>, vector<8x128xf32>
    %c6 = arith.constant 6 : index
    %c0_27 = arith.constant 0 : index
    %c0_28 = arith.constant 0 : index
    %68 = vector.load %arg1[%c6, %c0_27, %c0_28] : memref<8x8x128xf32, #tpu.memory_space<vmem>>, vector<1x8x128xf32>
    %69 = vector.shape_cast %68 : vector<1x8x128xf32> to vector<8x128xf32>
    %70 = arith.maximumf %59, %69 : vector<8x128xf32>
    %c6_i32 = arith.constant 6 : i32
    %71 = vector.broadcast %c6_i32 : i32 to vector<8x128xi32>
    %72 = arith.cmpi eq, %0, %71 : vector<8x128xi32>
    %73 = arith.select %72, %69, %62 : vector<8x128xi1>, vector<8x128xf32>
    %c6_i32_29 = arith.constant 6 : i32
    %74 = vector.broadcast %c6_i32_29 : i32 to vector<8x128xi32>
    %75 = arith.cmpi eq, %0, %74 : vector<8x128xi32>
    %c6_30 = arith.constant 6 : index
    %76 = memref.load %arg3[%c6_30] : memref<8xf32, #tpu.memory_space<smem>>
    %77 = vector.broadcast %76 : f32 to vector<8x128xf32>
    %78 = arith.select %75, %77, %67 : vector<8x128xi1>, vector<8x128xf32>
    %c7 = arith.constant 7 : index
    %c0_31 = arith.constant 0 : index
    %c0_32 = arith.constant 0 : index
    %79 = vector.load %arg1[%c7, %c0_31, %c0_32] : memref<8x8x128xf32, #tpu.memory_space<vmem>>, vector<1x8x128xf32>
    %80 = vector.shape_cast %79 : vector<1x8x128xf32> to vector<8x128xf32>
    %81 = arith.maximumf %70, %80 : vector<8x128xf32>
    %c7_i32 = arith.constant 7 : i32
    %82 = vector.broadcast %c7_i32 : i32 to vector<8x128xi32>
    %83 = arith.cmpi eq, %0, %82 : vector<8x128xi32>
    %84 = arith.select %83, %80, %73 : vector<8x128xi1>, vector<8x128xf32>
    %c7_i32_33 = arith.constant 7 : i32
    %85 = vector.broadcast %c7_i32_33 : i32 to vector<8x128xi32>
    %86 = arith.cmpi eq, %0, %85 : vector<8x128xi32>
    %c7_34 = arith.constant 7 : index
    %87 = memref.load %arg3[%c7_34] : memref<8xf32, #tpu.memory_space<smem>>
    %88 = vector.broadcast %87 : f32 to vector<8x128xf32>
    %89 = arith.select %86, %88, %78 : vector<8x128xi1>, vector<8x128xf32>
    %cst_35 = arith.constant 0.000000e+00 : f32
    %90 = vector.broadcast %cst_35 : f32 to vector<8x128xf32>
    %c0_36 = arith.constant 0 : index
    %c0_37 = arith.constant 0 : index
    %c0_38 = arith.constant 0 : index
    %91 = vector.load %arg1[%c0_36, %c0_37, %c0_38] : memref<8x8x128xf32, #tpu.memory_space<vmem>>, vector<1x8x128xf32>
    %92 = vector.shape_cast %91 : vector<1x8x128xf32> to vector<8x128xf32>
    %93 = arith.subf %92, %81 : vector<8x128xf32>
    %94 = math.exp %93 : vector<8x128xf32>
    %95 = arith.addf %90, %94 : vector<8x128xf32>
    %c1_39 = arith.constant 1 : index
    %c0_40 = arith.constant 0 : index
    %c0_41 = arith.constant 0 : index
    %96 = vector.load %arg1[%c1_39, %c0_40, %c0_41] : memref<8x8x128xf32, #tpu.memory_space<vmem>>, vector<1x8x128xf32>
    %97 = vector.shape_cast %96 : vector<1x8x128xf32> to vector<8x128xf32>
    %98 = arith.subf %97, %81 : vector<8x128xf32>
    %99 = math.exp %98 : vector<8x128xf32>
    %100 = arith.addf %95, %99 : vector<8x128xf32>
    %c2_42 = arith.constant 2 : index
    %c0_43 = arith.constant 0 : index
    %c0_44 = arith.constant 0 : index
    %101 = vector.load %arg1[%c2_42, %c0_43, %c0_44] : memref<8x8x128xf32, #tpu.memory_space<vmem>>, vector<1x8x128xf32>
    %102 = vector.shape_cast %101 : vector<1x8x128xf32> to vector<8x128xf32>
    %103 = arith.subf %102, %81 : vector<8x128xf32>
    %104 = math.exp %103 : vector<8x128xf32>
    %105 = arith.addf %100, %104 : vector<8x128xf32>
    %c3_45 = arith.constant 3 : index
    %c0_46 = arith.constant 0 : index
    %c0_47 = arith.constant 0 : index
    %106 = vector.load %arg1[%c3_45, %c0_46, %c0_47] : memref<8x8x128xf32, #tpu.memory_space<vmem>>, vector<1x8x128xf32>
    %107 = vector.shape_cast %106 : vector<1x8x128xf32> to vector<8x128xf32>
    %108 = arith.subf %107, %81 : vector<8x128xf32>
    %109 = math.exp %108 : vector<8x128xf32>
    %110 = arith.addf %105, %109 : vector<8x128xf32>
    %c4_48 = arith.constant 4 : index
    %c0_49 = arith.constant 0 : index
    %c0_50 = arith.constant 0 : index
    %111 = vector.load %arg1[%c4_48, %c0_49, %c0_50] : memref<8x8x128xf32, #tpu.memory_space<vmem>>, vector<1x8x128xf32>
    %112 = vector.shape_cast %111 : vector<1x8x128xf32> to vector<8x128xf32>
    %113 = arith.subf %112, %81 : vector<8x128xf32>
    %114 = math.exp %113 : vector<8x128xf32>
    %115 = arith.addf %110, %114 : vector<8x128xf32>
    %c5_51 = arith.constant 5 : index
    %c0_52 = arith.constant 0 : index
    %c0_53 = arith.constant 0 : index
    %116 = vector.load %arg1[%c5_51, %c0_52, %c0_53] : memref<8x8x128xf32, #tpu.memory_space<vmem>>, vector<1x8x128xf32>
    %117 = vector.shape_cast %116 : vector<1x8x128xf32> to vector<8x128xf32>
    %118 = arith.subf %117, %81 : vector<8x128xf32>
    %119 = math.exp %118 : vector<8x128xf32>
    %120 = arith.addf %115, %119 : vector<8x128xf32>
    %c6_54 = arith.constant 6 : index
    %c0_55 = arith.constant 0 : index
    %c0_56 = arith.constant 0 : index
    %121 = vector.load %arg1[%c6_54, %c0_55, %c0_56] : memref<8x8x128xf32, #tpu.memory_space<vmem>>, vector<1x8x128xf32>
    %122 = vector.shape_cast %121 : vector<1x8x128xf32> to vector<8x128xf32>
    %123 = arith.subf %122, %81 : vector<8x128xf32>
    %124 = math.exp %123 : vector<8x128xf32>
    %125 = arith.addf %120, %124 : vector<8x128xf32>
    %c7_57 = arith.constant 7 : index
    %c0_58 = arith.constant 0 : index
    %c0_59 = arith.constant 0 : index
    %126 = vector.load %arg1[%c7_57, %c0_58, %c0_59] : memref<8x8x128xf32, #tpu.memory_space<vmem>>, vector<1x8x128xf32>
    %127 = vector.shape_cast %126 : vector<1x8x128xf32> to vector<8x128xf32>
    %128 = arith.subf %127, %81 : vector<8x128xf32>
    %129 = math.exp %128 : vector<8x128xf32>
    %130 = arith.addf %125, %129 : vector<8x128xf32>
    %131 = math.log %130 : vector<8x128xf32>
    %132 = arith.addf %81, %131 : vector<8x128xf32>
    %133 = arith.subf %132, %84 : vector<8x128xf32>
    %134 = arith.mulf %89, %133 : vector<8x128xf32>
    %cst_60 = arith.constant 0.000000e+00 : f32
    %135 = vector.broadcast %cst_60 : f32 to vector<8x128xf32>
    %136 = arith.subf %135, %134 : vector<8x128xf32>
    %137 = math.exp %136 : vector<8x128xf32>
    %cst_61 = arith.constant 1.000000e+00 : f32
    %138 = vector.broadcast %cst_61 : f32 to vector<8x128xf32>
    %139 = arith.subf %138, %137 : vector<8x128xf32>
    %cst_62 = arith.constant 0.000000e+00 : f32
    %140 = vector.broadcast %cst_62 : f32 to vector<8x128xf32>
    %141 = arith.maximumf %139, %140 : vector<8x128xf32>
    %142 = arith.mulf %141, %141 : vector<8x128xf32>
    %143 = arith.mulf %142, %134 : vector<8x128xf32>
    %144 = vector.shape_cast %143 : vector<8x128xf32> to vector<1x8x128xf32>
    %cst_63 = arith.constant dense<0.000000e+00> : vector<8x128xf32>
    %145 = vector.multi_reduction <add>, %144, %cst_63 [0] : vector<1x8x128xf32> to vector<8x128xf32>
    %c0_64 = arith.constant 0 : index
    %c0_65 = arith.constant 0 : index
    %146 = vector.load %arg4[%c0_64, %c0_65] : memref<8x128xf32, #tpu.memory_space<vmem>>, vector<8x128xf32>
    tpu.vector_store %arg4[%c0_64, %c0_65], %145 {strides = array<i32>} : memref<8x128xf32, #tpu.memory_space<vmem>>, vector<8x128xf32>,
    return
  }
  func.func @transform_0(%arg0: i32) -> (i32, i32, i32) {
    %c0_i32 = arith.constant 0 : i32
    %c0_i32_0 = arith.constant 0 : i32
    %c0_i32_1 = arith.constant 0 : i32
    return %c0_i32, %arg0, %c0_i32_0 : i32, i32, i32
  }
  func.func @transform_1(%arg0: i32) -> (i32, i32) {
    %c0_i32 = arith.constant 0 : i32
    %c0_i32_0 = arith.constant 0 : i32
    return %arg0, %c0_i32 : i32, i32
  }
  func.func @transform_2(%arg0: i32) -> i32 {
    %c0_i32 = arith.constant 0 : i32
    %c0_i32_0 = arith.constant 0 : i32
    return %c0_i32 : i32
  }
  func.func @transform_3(%arg0: i32) -> (i32, i32) {
    %c0_i32 = arith.constant 0 : i32
    %c0_i32_0 = arith.constant 0 : i32
    return %arg0, %c0_i32 : i32, i32
  }
}

</mosaic_0001>

<bundles_post_ra>
// kernel: tpu_custom_call.1
= control target key start
LH: loop header
LB: loop body
LE: loop exit
PB: predicated region body
PF: predicated region fallthrough
CT: control target
= control target key end

     0   :  { %8 = vsyncpa [#allocation3], 0  ;;  %s405_s0 = inlined_call_operand.hbm [shape: f32[8,8,128], index: 0, kind: input, shape index: {}]   ;;  %s406_s1 = inlined_call_operand.hbm [shape: s32[8,128], index: 1, kind: input, shape index: {}]   ;;  %s407_s2 = inlined_call_operand.vmem [shape: f32[8], index: 2, kind: input, shape index: {}]   ;;  %s408_s3 = inlined_call_operand.hbm [shape: f32[8,128], index: 3, kind: output, shape index: {}]  }
   0x1   :  { %9 = vsyncpa [#allocation7], 0 }
   0x2   :  { %10 = vsyncpa [#allocation5], 0 }
   0x3   :  { %11 = vsyncpa [#allocation4], 0  ;;  %s299_s12 = smov [#allocation2]   ;;  %s213_s16 = scalar_lea.hbm %s405_s0, 1024 }
   0x4   :  { %s17_s13 = sshll.u32 %s299_s12, 4  ;;  %p214_p0 = scmp.ne.s32.totalorder %s405_s0, %s213_s16  ;;  %s18_s13 = int_to_ptr.vmem [resolvable:$true] %s17_s13 }
   0x5   :  { %p217_p1 = scmp.lt.u32.totalorder %s213_s16, %s405_s0 }
   0x7   :  { %p219_p2 = pnand %p217_p1, %p214_p0 }
   0x9   :  { %222 = shalt.err (!%p219_p2)
}
   0xa   :  { %s223_s21 = scalar_lea.vmem %s18_s13, 1024  ;;  %p228_p4 = scmp.lt.s32.totalorder %s18_s13, %s18_s13 }
   0xb   :  { %p224_p3 = scmp.ne.s32.totalorder %s18_s13, %s223_s21  ;;  %p229_p5 = scmp.lt.s32.totalorder %s223_s21, %s223_s21 }
   0xd   :  { %p230_p6 = por %p229_p5, %p228_p4 }
   0xf   :  { %p231_p7 = pnand %p230_p6, %p224_p3 }
  0x11   :  { %234 = shalt.err (!%p231_p7)
}
  0x12   :  { %s300_s22 = smov 128   ;;  %s301_s23 = smov 8  }
  0x13   :  { %23 = dma.hbm_to_vmem [thread:$0]  %s405_s0, 1024, %s18_s13, [#allocation3], %s300_s22, %s300_s22, %s301_s23  }
  0x14   :  { %s302_s26 = smov [#allocation6]   ;;  %s40_s30 = sshll.u32 %s407_s2, 4  ;;  %s41_s30 = int_to_ptr.vmem [resolvable:$true] %s40_s30 }
  0x15   :  { %s30_s27 = sshll.u32 %s302_s26, 4  ;;  %s235_s6 = scalar_lea.hbm %s406_s1, 128  ;;  %s31_s27 = int_to_ptr.vmem [resolvable:$true] %s30_s27 }
  0x16   :  { %p236_p8 = scmp.ne.s32.totalorder %s406_s1, %s235_s6  ;;  %p239_p9 = scmp.lt.u32.totalorder %s235_s6, %s406_s1 }
  0x18   :  { %p241_p10 = pnand %p239_p9, %p236_p8 }
  0x1a   :  { %244 = shalt.err (!%p241_p10)
}
  0x1b   :  { %s245_s0 = scalar_lea.vmem %s31_s27, 128  ;;  %p250_p12 = scmp.lt.s32.totalorder %s31_s27, %s31_s27 }
  0x1c   :  { %p246_p11 = scmp.ne.s32.totalorder %s31_s27, %s245_s0  ;;  %p251_p13 = scmp.lt.s32.totalorder %s245_s0, %s245_s0 }
  0x1e   :  { %p252_p0 = por %p251_p13, %p250_p12 }
  0x20   :  { %p253_p1 = pnand %p252_p0, %p246_p11 }
  0x22   :  { %256 = shalt.err (!%p253_p1)
}
  0x23   :  { %33 = dma.hbm_to_vmem [thread:$0]  %s406_s1, 128, %s31_s27, [#allocation7]  }
  0x24   :  { %s257_s12 = scalar_lea.vmem %s41_s30, 16  ;;  %p262_p3 = scmp.lt.s32.totalorder %s41_s30, %s41_s30 }
  0x25   :  { %p258_p2 = scmp.ne.s32.totalorder %s41_s30, %s257_s12  ;;  %p263_p4 = scmp.lt.s32.totalorder %s257_s12, %s257_s12 }
  0x27   :  { %p264_p5 = por %p263_p4, %p262_p3 }
  0x29   :  { %p265_p6 = pnand %p264_p5, %p258_p2 }
  0x2b   :  { %268 = shalt.err (!%p265_p6)
}
  0x2c   :  { %s303_s13 = smov [#allocation8]  }
  0x2d   :  { %43 = dma.vmem_to_smem %s41_s30, 16, %s303_s13, [#allocation5]  }
  0x2e   :  { %291 = dma.done.wait [#allocation3], 1024  }
  0x2f   :  { %292 = vsyncadd [#allocation3], 4294966272 }
  0x30   :  { %293 = dma.done.wait [#allocation7], 128  }
  0x31   :  { %294 = vsyncadd [#allocation7], 4294967168 }
  0x32   :  { %295 = dma.done.wait [#allocation5], 16  }
  0x33   :  { %296 = vsyncadd [#allocation5], 4294967280 }
  0x34   :  { %53 = sfence }
  0x35   :  { %v55_v0 = vld [vmem:[#allocation2] sm:$0xff]  ;;  %v62_v1 = vld [vmem:[#allocation2 + $0x8] sm:$0xff]  ;;  %v352_v3 = vld [vmem:[#allocation2 + $0x10] sm:$0xff]  ;;  %s58_s1 = sld [smem:[#allocation8]]  ;;  %s180_s14 = sld [smem:[#allocation8 + $0x1]] }
  0x36   :  { %v63_v2 = vmax.f32 %v55_v0, %v62_v1  ;;  %v354_v4 = vld [vmem:[#allocation2 + $0x18] sm:$0xff]  ;;  %v357_v6 = vld [vmem:[#allocation2 + $0x20] sm:$0xff]  ;;  %v360_v8 = vld [vmem:[#allocation2 + $0x28] sm:$0xff]  ;;  %s181_s15 = sld [smem:[#allocation8 + $0x2]]  ;;  %s182_s16 = sld [smem:[#allocation8 + $0x3]] }
  0x37   :  { %v363_v10 = vld [vmem:[#allocation2 + $0x30] sm:$0xff]  ;;  %v366_v12 = vld [vmem:[#allocation2 + $0x38] sm:$0xff]  ;;  %v54_v33 = vld [vmem:[#allocation6] sm:$0xff]  ;;  %s183_s17 = sld [smem:[#allocation8 + $0x4]]  ;;  %s184_s18 = sld [smem:[#allocation8 + $0x5]] }
  0x38   :  { %v71_v5 = vmax.f32 %v63_v2, %v352_v3  ;;  %vm56_vm0 = vcmp.eq.s32.totalorder %v54_v33, 0  ;;  %vm64_vm1 = vcmp.eq.s32.totalorder %v54_v33, 1  ;;  %vm72_vm2 = vcmp.eq.s32.totalorder %v54_v33, 2  ;;  %s185_s19 = sld [smem:[#allocation8 + $0x6]]  ;;  %s186_s20 = sld [smem:[#allocation8 + $0x7]] }
  0x39   :  { %v57_v42 = vsel %vm56_vm0, %v55_v0, 0.0  ;;  %vm80_vm3 = vcmp.eq.s32.totalorder %v54_v33, 3  ;;  %vm88_vm4 = vcmp.eq.s32.totalorder %v54_v33, 4  ;;  %vm96_vm5 = vcmp.eq.s32.totalorder %v54_v33, 5  ;;  %s304_s21 = smov [#allocation9]  }
  0x3a   :  { %v79_v7 = vmax.f32 %v71_v5, %v354_v4  ;;  %v65_v47 = vsel %vm64_vm1, %v62_v1, %v57_v42  ;;  %vm104_vm6 = vcmp.eq.s32.totalorder %v54_v33, 6  ;;  %vm112_vm7 = vcmp.eq.s32.totalorder %v54_v33, 7  ;;  %s169_s22 = sshll.u32 %s304_s21, 4  ;;  %s170_s22 = int_to_ptr.vmem [resolvable:$true] %s169_s22 }
  0x3b   :  { %v59_v39 = vstv %s58_s1  ;;  %v67_v46 = vstv %s180_s14  ;;  %v73_v53 = vsel %vm72_vm2, %v352_v3, %v65_v47  ;;  %s269_s23 = scalar_lea.vmem %s170_s22, 128  ;;  %p274_p8 = scmp.lt.s32.totalorder %s170_s22, %s170_s22 }
  0x3c   :  { %v87_v9 = vmax.f32 %v79_v7, %v357_v6  ;;  %v60_v45 = vsel %vm56_vm0, %v59_v39, 0.0  ;;  %v75_v51 = vstv %s181_s15  ;;  %v83_v56 = vstv %s182_s16  ;;  %p270_p7 = scmp.ne.s32.totalorder %s170_s22, %s269_s23  ;;  %p275_p9 = scmp.lt.s32.totalorder %s269_s23, %s269_s23 }
  0x3d   :  { %v68_v50 = vsel %vm64_vm1, %v67_v46, %v60_v45  ;;  %v81_v57 = vsel %vm80_vm3, %v354_v4, %v73_v53  ;;  %v91_v59 = vstv %s183_s17  ;;  %v99_v62 = vstv %s184_s18 }
  0x3e   :  { %v95_v11 = vmax.f32 %v87_v9, %v360_v8  ;;  %v76_v55 = vsel %vm72_vm2, %v75_v51, %v68_v50  ;;  %v89_v60 = vsel %vm88_vm4, %v357_v6, %v81_v57  ;;  %v115_v5 = vstv %s186_s20  ;;  %p276_p10 = por %p275_p9, %p274_p8 }
  0x3f   :  { %v84_v58 = vsel %vm80_vm3, %v83_v56, %v76_v55  ;;  %v97_v63 = vsel %vm96_vm5, %v360_v8, %v89_v60 }
  0x40   :  { %v103_v13 = vmax.f32 %v95_v11, %v363_v10  ;;  %v92_v61 = vsel %vm88_vm4, %v91_v59, %v84_v58  ;;  %v105_v2 = vsel %vm104_vm6, %v363_v10, %v97_v63  ;;  %p277_p11 = pnand %p276_p10, %p270_p7 }
  0x41   :  { %v113_v9 = vsel %vm112_vm7, %v366_v12, %v105_v2 }
  0x42   :  { %v370_v14 = vmax.f32 %v103_v13, %v366_v12 }
  0x44   :  { %v117_v15 = vsub.f32 %v55_v0, %v370_v14  ;;  %v121_v16 = vsub.f32 %v62_v1, %v370_v14  ;;  %v125_v17 = vsub.f32 %v352_v3, %v370_v14  ;;  %v129_v18 = vsub.f32 %v354_v4, %v370_v14 }
  0x45   :  { %v133_v19 = vsub.f32 %v357_v6, %v370_v14  ;;  %v137_v24 = vsub.f32 %v360_v8, %v370_v14  ;;  %v141_v26 = vsub.f32 %v363_v10, %v370_v14  ;;  %v145_v28 = vsub.f32 %v366_v12, %v370_v14 }
  0x46   :  { %v118_v20 = vmul.f32 1.442695, %v117_v15  ;;  %v122_v21 = vmul.f32 1.442695, %v121_v16  ;;  %v126_v22 = vmul.f32 1.442695, %v125_v17  ;;  %v100_v0 = vsel %vm96_vm5, %v99_v62, %v92_v61 }
  0x47   :  { %v130_v23 = vmul.f32 1.442695, %v129_v18  ;;  %v134_v25 = vmul.f32 1.442695, %v133_v19  ;;  %v138_v27 = vmul.f32 1.442695, %v137_v24  ;;  %v107_v1 = vstv %s185_s19 }
  0x48   :  { %193 = vpow2.f32 %v118_v20  ;;  %v142_v29 = vmul.f32 1.442695, %v141_v26  ;;  %v146_v30 = vmul.f32 1.442695, %v145_v28  ;;  %v108_v4 = vsel %vm104_vm6, %v107_v1, %v100_v0 }
  0x49   :  { %195 = vpow2.f32 %v122_v21  ;;  %v116_v11 = vsel %vm112_vm7, %v115_v5, %v108_v4 }
  0x4a   :  { %197 = vpow2.f32 %v126_v22 }
  0x4b   :  { %199 = vpow2.f32 %v130_v23 }
  0x4c   :  { %201 = vpow2.f32 %v134_v25 }
  0x4d   :  { %203 = vpow2.f32 %v138_v27 }
  0x4e   :  { %205 = vpow2.f32 %v142_v29 }
  0x4f   :  { %207 = vpow2.f32 %v146_v30 }
  0x52   :  { %v194_v31 = vpop.eup %193 }
  0x53   :  { %v196_v32 = vpop.eup %195 }
  0x54   :  { %v198_v34 = vpop.eup %197  ;;  %v124_v35 = vadd.f32 %v196_v32, %v194_v31 }
  0x55   :  { %v200_v36 = vpop.eup %199 }
  0x56   :  { %v128_v37 = vadd.f32 %v198_v34, %v124_v35  ;;  %v202_v38 = vpop.eup %201 }
  0x57   :  { %v204_v41 = vpop.eup %203 }
  0x58   :  { %v132_v40 = vadd.f32 %v200_v36, %v128_v37  ;;  %v206_v44 = vpop.eup %205 }
  0x59   :  { %v208_v49 = vpop.eup %207 }
  0x5a   :  { %v136_v43 = vadd.f32 %v202_v38, %v132_v40 }
  0x5c   :  { %v140_v48 = vadd.f32 %v204_v41, %v136_v43 }
  0x5e   :  { %v144_v52 = vadd.f32 %v206_v44, %v140_v48 }
  0x60   :  { %v148_v54 = vadd.f32 %v208_v49, %v144_v52 }
  0x62   :  { %209 = vlog2.f32 %v148_v54 }
  0x6c   :  { %v210_v3 = vpop.eup %209 }
  0x6d   :  { %v150_v7 = vmul.f32 0.6931472, %v210_v3 }
  0x6f   :  { %v151_v6 = vadd.f32 %v150_v7, %v370_v14 }
  0x71   :  { %v152_v13 = vsub.f32 %v151_v6, %v113_v9 }
  0x73   :  { %v153_v15 = vmul.f32 %v152_v13, %v116_v11 }
  0x75   :  { %v154_v16 = vsub.f32 0.0, %v153_v15 }
  0x77   :  { %v155_v17 = vmul.f32 1.442695, %v154_v16 }
  0x79   :  { %211 = vpow2.f32 %v155_v17 }
  0x83   :  { %v212_v8 = vpop.eup %211 }
  0x84   :  { %v157_v18 = vsub.f32 1.0, %v212_v8 }
  0x86   :  { %v158_v19 = vmax.f32 %v157_v18, 0.0 }
  0x88   :  { %v159_v10 = vmul.f32 %v158_v19, %v158_v19 }
  0x8a   :  { %v160_v20 = vmul.f32 %v159_v10, %v153_v15 }
  0x8c   :  { %162 = vst [vmem:[#allocation9] sm:$0xff] %v160_v20 }
  0x8d   :  { %280 = shalt.err (!%p277_p11)
}
  0x8e   :  { %s281_s26 = scalar_lea.hbm %s408_s3, 128 }
  0x8f   :  { %p282_p12 = scmp.ne.s32.totalorder %s408_s3, %s281_s26  ;;  %p285_p13 = scmp.lt.u32.totalorder %s281_s26, %s408_s3 }
  0x91   :  { %p287_p0 = pnand %p285_p13, %p282_p12 }
  0x93   :  { %290 = shalt.err (!%p287_p0)
}
  0x94   :  { %172 = dma.vmem_to_hbm [thread:$0]  %s170_s22, 128, %s408_s3, [#allocation4]  }
  0x95   :  { %297 = dma.done.wait [#allocation4], 128  }
  0x96   :  { %298 = vsyncadd [#allocation4], 4294967168 }
  0x97   :  { %176 = vsyncpa [#allocation3], 1 }
  0x98   :  { %177 = vsyncpa [#allocation7], 1 }
  0x99   :  { %178 = vsyncpa [#allocation4], 1 }
  0x9a   :  { %179 = vsyncpa [#allocation5], 1 }

</bundles_post_ra>
